<compile_context>
chip_gen: v7x
topology: tpu7x:2x2x1
jax: 0.10.0
libtpu: 0.0.40
codegen_flags: <defaults>
</compile_context>

<pallas_src>
import functools

import jax
import jax.numpy as jnp
from jax.experimental import pallas as pl
from jax.experimental.pallas import tpu as pltpu

_LANES = 128


def _dice_ce_kernel(logits_ref, tgt_ref, inter_ref, ce_ref, *, hw, s_tile, need_mask):
    j = pl.program_id(1)

    @pl.when(j == 0)
    def _init():
        inter_ref[...] = jnp.zeros_like(inter_ref)
        ce_ref[...] = jnp.zeros_like(ce_ref)

    x = logits_ref[0].astype(jnp.float32)        # (C, S, 128): class = vreg-major dim
    t = tgt_ref[...].astype(jnp.int32)           # (1, S, 128)
    c, s, l = x.shape

    # Per-pixel logsumexp pieces; the class reduction is plain VPU max/add over
    # C full vregs (no cross-sublane XLU work).
    m = jnp.max(x, axis=0, keepdims=True)                      # (1, S, 128)
    e = jnp.exp(x - m)                                         # (C, S, 128)  C exps/pixel
    denom = jnp.sum(e, axis=0)                                 # (S, 128)

    # Target-class logit / exponential via a shared select-sum (no one-hot matmul,
    # no extra exp for the target probability).
    cls = jax.lax.broadcasted_iota(jnp.int32, (c, s, l), 0)
    is_t = cls == t                                            # (C, S, 128) bool
    x_t = jnp.sum(jnp.where(is_t, x, 0.0), axis=0)             # (S, 128)
    e_t = jnp.sum(jnp.where(is_t, e, 0.0), axis=0)             # (S, 128)

    p_t = e_t / denom                                          # softmax prob of target
    ce_px = m[0] + jnp.log(denom) - x_t                        # per-pixel CE

    if need_mask:
        # Select (not multiply) so Inf/NaN garbage in ragged tail rows can't leak.
        row = jax.lax.broadcasted_iota(jnp.int32, (s, l), 0)
        lane = jax.lax.broadcasted_iota(jnp.int32, (s, l), 1)
        pix = (j * s_tile + row) * l + lane
        valid = pix < hw
        p_t = jnp.where(valid, p_t, 0.0)
        ce_px = jnp.where(valid, ce_px, 0.0)

    # Fold to a single lane-vector per block and accumulate in the tiny resident
    # output block (VMEM RMW; HBM writeback is only (1,1,128) f32 per batch).
    inter_ref[...] += jnp.sum(p_t, axis=0, keepdims=True)[None]
    ce_ref[...] += jnp.sum(ce_px, axis=0, keepdims=True)[None]


def _choose_s_tile(s_total, c, *, target_bytes=2 << 20, max_rows=2048):
    # Size the pixel-row tile so the f32 working copy of one logits block is about
    # target_bytes; round to a multiple of 32 rows (layout-friendly for f32/bf16/int8).
    rows = (target_bytes // (c * _LANES * 4)) // 32 * 32
    rows = max(32, min(rows, max_rows))
    if rows >= s_total:
        return int(s_total)
    return int(rows)


def dice_ce_loss(logits_nchw, targets_nhw, *, dice_weight=1.0, ce_weight=1.0,
                 eps=1e-5, s_tile=None):
    # TODO(synk): the optional per-class/per-sample `weight` argument of the PyTorch
    # module is not supported (weight=None path only).
    n, c, h, w = logits_nchw.shape
    hw = h * w
    s_total = pl.cdiv(hw, _LANES)
    hw_pad = s_total * _LANES

    x = logits_nchw.reshape(n, c, hw)
    t = targets_nhw.reshape(n, hw)
    if hw_pad != hw:
        # Rare path: only when H*W is not a multiple of 128. Zero-padded pixels are
        # masked out in-kernel.
        x = jnp.pad(x, ((0, 0), (0, 0), (0, hw_pad - hw)))
        t = jnp.pad(t, ((0, 0), (0, hw_pad - hw)))
    x = x.reshape(n, c, s_total, _LANES)      # free row-major reshapes
    t = t.reshape(n, s_total, _LANES)

    if s_tile is None:
        s_tile = _choose_s_tile(s_total, c)
    n_tiles = pl.cdiv(s_total, s_tile)
    need_mask = (n_tiles * s_tile * _LANES != hw)

    kernel = functools.partial(_dice_ce_kernel, hw=hw, s_tile=s_tile,
                               need_mask=need_mask)

    # Derive the scoped-VMEM budget from the actual block footprint (double-buffered
    # inputs + f32 temporaries + headroom), capped safely under v7x's 64 MiB VMEM.
    blk_x = c * s_tile * _LANES * jnp.dtype(x.dtype).itemsize
    blk_t = s_tile * _LANES * jnp.dtype(t.dtype).itemsize
    blk_f32 = c * s_tile * _LANES * 4
    vmem_limit = int(min(48 << 20, 2 * (blk_x + blk_t) + 6 * blk_f32 + (8 << 20)))

    out_inter, out_ce = pl.pallas_call(
        kernel,
        out_shape=(jax.ShapeDtypeStruct((n, 1, _LANES), jnp.float32),
                   jax.ShapeDtypeStruct((n, 1, _LANES), jnp.float32)),
        grid_spec=pltpu.PrefetchScalarGridSpec(
            num_scalar_prefetch=0,
            grid=(n, n_tiles),
            in_specs=[
                pl.BlockSpec((1, c, s_tile, _LANES), lambda b, j: (b, 0, j, 0)),
                pl.BlockSpec((1, s_tile, _LANES), lambda b, j: (b, j, 0)),
            ],
            out_specs=[
                pl.BlockSpec((1, 1, _LANES), lambda b, j: (b, 0, 0)),
                pl.BlockSpec((1, 1, _LANES), lambda b, j: (b, 0, 0)),
            ],
        ),
        compiler_params=pltpu.CompilerParams(
            dimension_semantics=("parallel", "arbitrary"),
            vmem_limit_bytes=vmem_limit),
    )(x, t)

    # Tiny finalize in plain XLA: N*1KiB partials per quantity.
    total = jnp.float32(n * hw)
    inter = jnp.sum(out_inter)
    ce_sum = jnp.sum(out_ce)
    # sum(softmax) == sum(onehot) == total exactly, so the dice denominator == 2*total.
    dice = 1.0 - (2.0 * inter + eps) / (2.0 * total + eps)
    ce_mean = ce_sum / total
    return jnp.float32(dice_weight) * dice + jnp.float32(ce_weight) * ce_mean


def _reference(logits, targets, dice_weight=1.0, ce_weight=1.0, eps=1e-5):
    n, c, h, w = logits.shape
    probs = jax.nn.softmax(logits.astype(jnp.float32), axis=1)
    onehot = jax.nn.one_hot(targets, c, dtype=jnp.float32).transpose(0, 3, 1, 2)
    inter = jnp.sum(probs * onehot)
    denom = jnp.sum(probs) + jnp.sum(onehot)
    dice = 1.0 - (2.0 * inter + eps) / (denom + eps)
    logp = jax.nn.log_softmax(logits.astype(jnp.float32), axis=1)
    ce = -jnp.mean(jnp.sum(logp * onehot, axis=1))
    return dice_weight * dice + ce_weight * ce


if __name__ == "__main__":
    key = jax.random.PRNGKey(0)
    k_logits, k_tgt = jax.random.split(key)

    N, C, H, W = 2, 4, 16, 16
    logits = jax.random.normal(k_logits, (N, C, H, W), dtype=jnp.float32)
    targets = jax.random.randint(k_tgt, (N, H, W), 0, C, dtype=jnp.int32)

    loss = dice_ce_loss(logits, targets, dice_weight=1.0, ce_weight=1.0, eps=1e-5)
    loss = jax.block_until_ready(loss)

    ref = _reference(logits, targets)
    assert jnp.abs(loss - ref) < 1e-4 * max(1.0, float(jnp.abs(ref))), (loss, ref)
    print("KERNEL_OK")
</pallas_src>

<mosaic_0001>
module attributes {stable_mosaic.version = 11 : i64} {
  func.func @_dice_ce_kernel(%arg0: i32, %arg1: i32, %arg2: memref<1x4x2x128xf32, #tpu.memory_space<vmem>>, %arg3: memref<1x2x128xi32, #tpu.memory_space<vmem>>, %arg4: memref<1x1x128xf32, #tpu.memory_space<vmem>>, %arg5: memref<1x1x128xf32, #tpu.memory_space<vmem>>) attributes {dimension_semantics = [#tpu.dimension_semantics<parallel>, #tpu.dimension_semantics<arbitrary>], iteration_bounds = array<i64: 2, 1>, scalar_prefetch = 0 : i64, scratch_operands = 0 : i64, tpu.core_type = #tpu.core_type<tc>, window_params = [{transform_indices = @transform_0, window_bounds = array<i64: 1, 4, 2, 128>}, {transform_indices = @transform_1, window_bounds = array<i64: 1, 2, 128>}, {transform_indices = @transform_2, window_bounds = array<i64: 1, 1, 128>}, {transform_indices = @transform_3, window_bounds = array<i64: 1, 1, 128>}]} {
    %c0_i32 = arith.constant 0 : i32
    %0 = arith.cmpi eq, %arg1, %c0_i32 : i32
    %1 = arith.extui %0 : i1 to i32
    %c0_i32_0 = arith.constant 0 : i32
    %2 = arith.cmpi ne, %1, %c0_i32_0 : i32
    scf.if %2 {
      %cst_26 = arith.constant 0.000000e+00 : f32
      %38 = vector.broadcast %cst_26 : f32 to vector<1x1x128xf32>
      %c0_27 = arith.constant 0 : index
      %c0_28 = arith.constant 0 : index
      %c0_29 = arith.constant 0 : index
      %39 = vector.load %arg4[%c0_27, %c0_28, %c0_29] : memref<1x1x128xf32, #tpu.memory_space<vmem>>, vector<1x1x128xf32>
      tpu.vector_store %arg4[%c0_27, %c0_28, %c0_29], %38 {strides = array<i32>} : memref<1x1x128xf32, #tpu.memory_space<vmem>>, vector<1x1x128xf32>,
      %cst_30 = arith.constant 0.000000e+00 : f32
      %40 = vector.broadcast %cst_30 : f32 to vector<1x1x128xf32>
      %c0_31 = arith.constant 0 : index
      %c0_32 = arith.constant 0 : index
      %c0_33 = arith.constant 0 : index
      %41 = vector.load %arg5[%c0_31, %c0_32, %c0_33] : memref<1x1x128xf32, #tpu.memory_space<vmem>>, vector<1x1x128xf32>
      tpu.vector_store %arg5[%c0_31, %c0_32, %c0_33], %40 {strides = array<i32>} : memref<1x1x128xf32, #tpu.memory_space<vmem>>, vector<1x1x128xf32>,
    } else {
    }
    %c0 = arith.constant 0 : index
    %c0_1 = arith.constant 0 : index
    %c0_2 = arith.constant 0 : index
    %c0_3 = arith.constant 0 : index
    %3 = vector.load %arg2[%c0, %c0_1, %c0_2, %c0_3] : memref<1x4x2x128xf32, #tpu.memory_space<vmem>>, vector<1x4x2x128xf32>
    %4 = vector.shape_cast %3 : vector<1x4x2x128xf32> to vector<4x2x128xf32>
    %c0_4 = arith.constant 0 : index
    %c0_5 = arith.constant 0 : index
    %c0_6 = arith.constant 0 : index
    %5 = vector.load %arg3[%c0_4, %c0_5, %c0_6] : memref<1x2x128xi32, #tpu.memory_space<vmem>>, vector<1x2x128xi32>
    %cst = arith.constant dense<0xFF800000> : vector<2x128xf32>
    %6 = vector.multi_reduction <maximumf>, %4, %cst [0] : vector<4x2x128xf32> to vector<2x128xf32>
    %7 = vector.shape_cast %6 : vector<2x128xf32> to vector<1x2x128xf32>
    %8 = vector.broadcast %7 : vector<1x2x128xf32> to vector<4x2x128xf32>
    %9 = arith.subf %4, %8 : vector<4x2x128xf32>
    %10 = math.exp %9 : vector<4x2x128xf32>
    %cst_7 = arith.constant dense<0.000000e+00> : vector<2x128xf32>
    %11 = vector.multi_reduction <add>, %10, %cst_7 [0] : vector<4x2x128xf32> to vector<2x128xf32>
    %12 = tpu.iota {dimensions = array<i32: 0>} : vector<4x2x128xi32>
    %13 = vector.broadcast %5 : vector<1x2x128xi32> to vector<4x2x128xi32>
    %14 = arith.cmpi eq, %12, %13 : vector<4x2x128xi32>
    %cst_8 = arith.constant 0.000000e+00 : f32
    %15 = vector.broadcast %cst_8 : f32 to vector<4x2x128xf32>
    %16 = arith.select %14, %4, %15 : vector<4x2x128xi1>, vector<4x2x128xf32>
    %cst_9 = arith.constant dense<0.000000e+00> : vector<2x128xf32>
    %17 = vector.multi_reduction <add>, %16, %cst_9 [0] : vector<4x2x128xf32> to vector<2x128xf32>
    %cst_10 = arith.constant 0.000000e+00 : f32
    %18 = vector.broadcast %cst_10 : f32 to vector<4x2x128xf32>
    %19 = arith.select %14, %10, %18 : vector<4x2x128xi1>, vector<4x2x128xf32>
    %cst_11 = arith.constant dense<0.000000e+00> : vector<2x128xf32>
    %20 = vector.multi_reduction <add>, %19, %cst_11 [0] : vector<4x2x128xf32> to vector<2x128xf32>
    %21 = arith.divf %20, %11 : vector<2x128xf32>
    %22 = vector.shape_cast %7 : vector<1x2x128xf32> to vector<2x128xf32>
    %23 = math.log %11 : vector<2x128xf32>
    %24 = arith.addf %22, %23 : vector<2x128xf32>
    %25 = arith.subf %24, %17 : vector<2x128xf32>
    %c0_12 = arith.constant 0 : index
    %c0_13 = arith.constant 0 : index
    %c0_14 = arith.constant 0 : index
    %26 = vector.load %arg4[%c0_12, %c0_13, %c0_14] : memref<1x1x128xf32, #tpu.memory_space<vmem>>, vector<1x1x128xf32>
    %cst_15 = arith.constant dense<0.000000e+00> : vector<128xf32>
    %27 = vector.multi_reduction <add>, %21, %cst_15 [0] : vector<2x128xf32> to vector<128xf32>
    %28 = vector.shape_cast %27 : vector<128xf32> to vector<1x128xf32>
    %29 = vector.shape_cast %28 : vector<1x128xf32> to vector<1x1x128xf32>
    %30 = arith.addf %26, %29 : vector<1x1x128xf32>
    %c0_16 = arith.constant 0 : index
    %c0_17 = arith.constant 0 : index
    %c0_18 = arith.constant 0 : index
    %31 = vector.load %arg4[%c0_16, %c0_17, %c0_18] : memref<1x1x128xf32, #tpu.memory_space<vmem>>, vector<1x1x128xf32>
    tpu.vector_store %arg4[%c0_16, %c0_17, %c0_18], %30 {strides = array<i32>} : memref<1x1x128xf32, #tpu.memory_space<vmem>>, vector<1x1x128xf32>,
    %c0_19 = arith.constant 0 : index
    %c0_20 = arith.constant 0 : index
    %c0_21 = arith.constant 0 : index
    %32 = vector.load %arg5[%c0_19, %c0_20, %c0_21] : memref<1x1x128xf32, #tpu.memory_space<vmem>>, vector<1x1x128xf32>
    %cst_22 = arith.constant dense<0.000000e+00> : vector<128xf32>
    %33 = vector.multi_reduction <add>, %25, %cst_22 [0] : vector<2x128xf32> to vector<128xf32>
    %34 = vector.shape_cast %33 : vector<128xf32> to vector<1x128xf32>
    %35 = vector.shape_cast %34 : vector<1x128xf32> to vector<1x1x128xf32>
    %36 = arith.addf %32, %35 : vector<1x1x128xf32>
    %c0_23 = arith.constant 0 : index
    %c0_24 = arith.constant 0 : index
    %c0_25 = arith.constant 0 : index
    %37 = vector.load %arg5[%c0_23, %c0_24, %c0_25] : memref<1x1x128xf32, #tpu.memory_space<vmem>>, vector<1x1x128xf32>
    tpu.vector_store %arg5[%c0_23, %c0_24, %c0_25], %36 {strides = array<i32>} : memref<1x1x128xf32, #tpu.memory_space<vmem>>, vector<1x1x128xf32>,
    return
  }
  func.func @transform_0(%arg0: i32, %arg1: i32) -> (i32, i32, i32, i32) {
    %c0_i32 = arith.constant 0 : i32
    %c0_i32_0 = arith.constant 0 : i32
    %c0_i32_1 = arith.constant 0 : i32
    return %arg0, %c0_i32, %arg1, %c0_i32_0 : i32, i32, i32, i32
  }
  func.func @transform_1(%arg0: i32, %arg1: i32) -> (i32, i32, i32) {
    %c0_i32 = arith.constant 0 : i32
    %c0_i32_0 = arith.constant 0 : i32
    return %arg0, %arg1, %c0_i32 : i32, i32, i32
  }
  func.func @transform_2(%arg0: i32, %arg1: i32) -> (i32, i32, i32) {
    %c0_i32 = arith.constant 0 : i32
    %c0_i32_0 = arith.constant 0 : i32
    %c0_i32_1 = arith.constant 0 : i32
    return %arg0, %c0_i32, %c0_i32_0 : i32, i32, i32
  }
  func.func @transform_3(%arg0: i32, %arg1: i32) -> (i32, i32, i32) {
    %c0_i32 = arith.constant 0 : i32
    %c0_i32_0 = arith.constant 0 : i32
    %c0_i32_1 = arith.constant 0 : i32
    return %arg0, %c0_i32, %c0_i32_0 : i32, i32, i32
  }
}

</mosaic_0001>

<bundles_post_ra>
// kernel: tpu_custom_call.1
= control target key start
LH: loop header
LB: loop body
LE: loop exit
PB: predicated region body
PF: predicated region fallthrough
CT: control target
= control target key end

     0   :  { %9 = vsyncpa [#allocation3], 0  ;;  %s1103_s0 = inlined_call_operand.hbm [shape: f32[2,4,2,128], index: 0, kind: input, shape index: {}]   ;;  %s1104_s1 = inlined_call_operand.hbm [shape: s32[2,2,128], index: 1, kind: input, shape index: {}]   ;;  %s1105_s2 = inlined_call_operand.hbm [shape: f32[2,1,128], index: 2, kind: output, shape index: {0}]   ;;  %s1106_s3 = inlined_call_operand.hbm [shape: f32[2,1,128], index: 3, kind: output, shape index: {1}]  }
   0x1   :  { %11 = vsyncpa [#allocation3 + $0x1], 0 }
   0x2   :  { %12 = vsyncpa [#allocation6], 0 }
   0x3   :  { %14 = vsyncpa [#allocation6 + $0x1], 0 }
   0x4   :  { %15 = vsyncpa [#allocation4], 0 }
   0x5   :  { %17 = vsyncpa [#allocation4 + $0x1], 0 }
   0x6   :  { %18 = vsyncpa [#allocation9], 0 }
   0x7   :  { %20 = vsyncpa [#allocation9 + $0x1], 0  ;;  %s812_s12 = smov 0   ;;  %s814_s13 = smov 0  }
   0x8   :  { %s816_s14 = smov 0   ;;  %s818_s15 = smov 0  }
   0x9   :  { %s820_s16 = smov 0   ;;  %s822_s17 = smov 0  }
   0xa LB: > { %s501_s18 = sadd.s32 4294967295, %s783_s17   ;;  %s502_s19 = sadd.s32 4294967294, %s783_s17   ;;  %s783_s17 = sphi %s822_s17, %s26_s17   ;;  %s779_s16 = sphi %s820_s16, %s1125_s16   ;;  %s775_s15 = sphi %s818_s15, %s1124_s15   ;;  %s771_s14 = sphi %s816_s14, %s1123_s14   ;;  %s767_s13 = sphi %s814_s13, %s1122_s13   ;;  %s763_s12 = sphi %s812_s12, %s1121_s12  }
   0xb   : > { %s38_s20 = sadd.s32 1, %s779_s16  ;;  %s47_s21 = sadd.s32 1, %s771_s14 }
   0xc   : > { %p40_p0 = scmp.ge.s32.totalorder %s38_s20, 2  ;;  %p54_p1 = scmp.ne.s32.totalorder %s771_s14, %s767_s13 }
   0xd   : > { %p55_p2 = scmp.eq.s32.totalorder %s783_s17, 0  ;;  %p60_p3 = scmp.ne.s32.totalorder %s767_s13, %s763_s12 }
   0xe   : > { %s1127_s20 = smov (%p40_p0, %s38_s20), 0  ;;  %p61_p5 = scmp.eq.s32.totalorder %s501_s18, 0 }
   0xf   : > { %p853_p4 = por %p55_p2, %p54_p1  ;;  %s42_s23 = ssub.s32 %s779_s16, %s1127_s20 }
  0x10   : > { %p112_p6 = scmp.eq.s32.totalorder %s501_s18, 1  ;;  %p45_p7 = scmp.eq.s32.totalorder %s42_s23, 0 }
  0x11   : > { %p859_p8 = por %p61_p5, %p60_p3  ;;  %p118_p10 = scmp.eq.s32.totalorder %s502_s19, 1 }
  0x12   : > { %p863_p9 = por %p112_p6, %p54_p1  ;;  %p540_p13 = scmp.lt.s32.totalorder %s783_s17, 2 }
  0x13   : > { %s1110_s24 = scalar_select %p859_p8, 1, 0 }
  0x14   : > { %s1111_s25 = scalar_select %p863_p9, 1, 0 }
  0x15   : > { %s868_s26 = scalar_select %p45_p7, %s771_s14, %s47_s21  }
  0x16   : > { %p870_p11 = por %p118_p10, %p60_p3  ;;  %s877_s28 = sand.u32 1, %s771_s14  }
  0x17   : > { %s505_s29 = sshll.u32 %s877_s28, 3  ;;  %s517_s30 = sshll.u32 %s779_s16, 7 }
  0x18   : > { %s1112_s27 = scalar_select %p870_p11, 1, 0 }
  0x19   : > { %s884_s6 = scalar_lea.hbm %s1103_s0, %s517_s30  ;;  %s168_s7 = scalar_lea.vmem [#allocation2], %s505_s29 }
  0x1a   : > { %s176_s8 = sshll.u32 %s168_s7, 4  ;;  %p890_p0 = pnand %p540_p13, %p853_p4  ;;  %s886_s8 = int_to_ptr.vmem [resolvable:$true] %s176_s8 }
  0x1b   : > { %s165_s10 = scalar_lea.sflag [#allocation3], %s877_s28  ;;  %s605_s11 = scalar_lea.hbm %s884_s6, 128 }
  0x1c   : > { %p606_p2 = scmp.ne.s32.totalorder %s884_s6, %s605_s11  ;;  %p607_p3 = pneg %p890_p0 }
  0x1d   : > { %s610_s21 = scalar_lea.hbm %s1103_s0, 256  ;;  %p611_p4 = scmp.lt.u32.totalorder %s884_s6, %s1103_s0 }
  0x1e   : > { %p608_p5 = pnand %p607_p3, %p606_p2  ;;  %p612_p7 = scmp.lt.u32.totalorder %s610_s21, %s605_s11 }
  0x1f   : > { %p614_p13 = scmp.lt.u32.totalorder %s605_s11, %s884_s6 }
  0x20   : > { %p609_p6 = pneg %p608_p5  ;;  %p613_p10 = por %p612_p7, %p611_p4 }
  0x22   : > { %p615_p12 = por %p614_p13, %p613_p10 }
  0x24   : > { %p616_p1 = pnand %p615_p12, %p609_p6 }
  0x26   : > { %619 = shalt.err (!%p616_p1)
}
  0x27   : > { %s620_s29 = scalar_lea.vmem %s886_s8, 128  ;;  %s785_s30 = smov [#allocation2]  }
  0x28   : > { %p621_p2 = scmp.ne.s32.totalorder %s886_s8, %s620_s29  ;;  %s625_s4 = sshll.u32 %s785_s30, 4  ;;  %s626_s4 = int_to_ptr.vmem [resolvable:$false] %s625_s4 }
  0x29   : > { %s627_s5 = scalar_lea.vmem %s626_s4, 256  ;;  %p628_p9 = scmp.lt.s32.totalorder %s886_s8, %s626_s4 }
  0x2a   : > { %p623_p5 = pnand %p621_p2, %p607_p3  ;;  %p629_p4 = scmp.lt.s32.totalorder %s627_s5, %s620_s29 }
  0x2c   : > { %p624_p11 = pneg %p623_p5  ;;  %p630_p7 = por %p629_p4, %p628_p9 }
  0x2e   : > { %p631_p10 = pnand %p630_p7, %p624_p11 }
  0x30   : > { %634 = shalt.err (!%p631_p10)
}
  0x31   : > { %s786_s7 = smov 32   ;;  %s787_s11 = smov 2  }
  0x32   : > { %529 = dma.hbm_to_vmem [thread:$0]  (!%p890_p0), %s884_s6, 128, %s886_s8, %s165_s10, %s786_s7, %s786_s7, %s787_s11  }
  0x33   : > { %p203_p12 = scmp.lt.s32.totalorder %s783_s17, 3  ;;  %s508_s18 = sshll.u32 %s877_s28, 1 }
  0x34   : > { %s509_s19 = sshll.u32 %s779_s16, 5  ;;  %p1114_p9 = scmp.ge.s32.totalorder %s783_s17, 1 }
  0x35   : > { %s935_s29 = scalar_lea.hbm %s1104_s1, %s509_s19  ;;  %s190_s30 = scalar_lea.vmem [#allocation5], %s508_s18 }
  0x36   : > { %p928_p11 = pnand %p1114_p9, %p203_p12  ;;  %s198_s4 = sshll.u32 %s190_s30, 4  ;;  %s199_s4 = int_to_ptr.vmem [resolvable:$true] %s198_s4 }
  0x37   : > { %s187_s6 = scalar_lea.sflag [#allocation6], %s877_s28  ;;  %s635_s8 = scalar_lea.hbm %s935_s29, 32 }
  0x38   : > { %s1115_s21 = scalar_select %p928_p11, 1, 0 }
  0x39   : > { %p636_p1 = scmp.ne.s32.totalorder %s935_s29, %s635_s8  ;;  %s640_s7 = scalar_lea.hbm %s1104_s1, 64 }
  0x3a   : > { %p641_p2 = scmp.lt.u32.totalorder %s935_s29, %s1104_s1  ;;  %p642_p5 = scmp.lt.u32.totalorder %s640_s7, %s635_s8 }
  0x3b   : > { %p638_p6 = pnand %p636_p1, %p607_p3  ;;  %p644_p7 = scmp.lt.u32.totalorder %s635_s8, %s935_s29 }
  0x3c   : > { %p643_p4 = por %p642_p5, %p641_p2 }
  0x3d   : > { %p639_p13 = pneg %p638_p6 }
  0x3e   : > { %p645_p10 = por %p644_p7, %p643_p4 }
  0x40   : > { %p646_p12 = pnand %p645_p10, %p639_p13 }
  0x42   : > { %649 = shalt.err (!%p646_p12)
}
  0x43   : > { %s650_s28 = scalar_lea.vmem %s199_s4, 32  ;;  %s788_s18 = smov [#allocation5]  }
  0x44   : > { %p651_p9 = scmp.ne.s32.totalorder %s199_s4, %s650_s28  ;;  %s655_s22 = sshll.u32 %s788_s18, 4  ;;  %s656_s22 = int_to_ptr.vmem [resolvable:$false] %s655_s22 }
  0x45   : > { %s657_s23 = scalar_lea.vmem %s656_s22, 64  ;;  %p658_p8 = scmp.lt.s32.totalorder %s199_s4, %s656_s22 }
  0x46   : > { %p653_p1 = pnand %p651_p9, %p607_p3  ;;  %p659_p11 = scmp.lt.s32.totalorder %s657_s23, %s650_s28 }
  0x48   : > { %p654_p6 = pneg %p653_p1  ;;  %p660_p2 = por %p659_p11, %p658_p8 }
  0x4a   : > { %p661_p5 = pnand %p660_p2, %p654_p6 }
  0x4c   : > { %664 = shalt.err (!%p661_p5)
}
  0x4d   : > { %532 = dma.hbm_to_vmem [thread:$0]  (!%p890_p0), %s935_s29, 32, %s199_s4, %s187_s6  }
  0x4e   : > { %p1116_p13 = scmp.ne.s32.totalorder %s1115_s21, 0 }
  0x4f   : > { %s960_s30 = sand.u32 (!%p1116_p13), 1, %s767_s13   ;;  %p1117_p3 = scmp.ne.s32.totalorder (!%p1116_p13), %s1110_s24, 0 }
  0x50   : > { %207 = sbr.rel (%p1116_p13) target bundleno = 188 (0xbc), region = 28  ;;  %s511_s8 = sshll.u32 (!%p1116_p13), %s960_s30, 3 }
  0x51   : > { %s210_s10 = scalar_lea.sflag (!%p1116_p13), [#allocation3], %s960_s30  ;;  %s213_s5 = scalar_lea.vmem (!%p1116_p13), [#allocation2], %s511_s8 }
  0x57   : > { %746 = dma.done.wait (%p1117_p3), %s210_s10, 128  }
  0x58   : > { %748 = vsyncadd (%p1117_p3), %s210_s10, 4294967168  ;;  %s512_s9 = sshll.u32 %s960_s30, 1  ;;  %s219_s21 = scalar_lea.sflag [#allocation6], %s960_s30 }
  0x59   : > { %s970_s29 = scalar_lea.vmem [#allocation5], %s512_s9 }
  0x5a   : > { %750 = dma.done.wait (%p1117_p3), %s219_s21, 32  }
  0x5b   : > { %752 = vsyncadd (%p1117_p3), %s219_s21, 4294967264  ;;  %s977_s4 = scalar_lea.vmem [#allocation7], %s960_s30  ;;  %v789_v0 = vmov 0.0   ;;  %s981_s6 = scalar_lea.vmem [#allocation8], %s960_s30  ;;  %vm264_vm0 = vcmask 1041408  }
  0x5c   : > { %257 = vst [vmem:[%s977_s4] sm:$0x1] %v789_v0  ;;  %258 = vst [vmem:[%s981_s6] sm:$0x1] %v789_v0  ;;  %v259_v1 = vld [vmem:[%s213_s5] sm:$0x3]  ;;  %v260_v2 = vld [vmem:[%s213_s5 + $0x2] sm:$0x3] }
  0x5d   : > { %v261_v3 = vld [vmem:[%s213_s5 + $0x4] sm:$0x3]  ;;  %v262_v4 = vld [vmem:[%s213_s5 + $0x6] sm:$0x3]  ;;  %v265_v5 = vsel %vm264_vm0, %v259_v1, -inf  ;;  %v266_v6 = vsel %vm264_vm0, %v260_v2, -inf }
  0x5e   : > { %v267_v7 = vsel %vm264_vm0, %v261_v3, -inf  ;;  %v268_v8 = vsel %vm264_vm0, %v262_v4, -inf  ;;  %v269_v9 = vmax.f32 %v265_v5, %v266_v6  ;;  %v263_v20 = vld [vmem:[%s970_s29] sm:$0x3]  ;;  %s513_s24 = sshll.u32 %s775_s15, 4  ;;  %s360_s7 = sshll.u32 %s977_s4, 4  ;;  %s1019_s7 = int_to_ptr.vmem [resolvable:$true] %s360_s7 }
  0x5f   : > { %v270_v10 = vmax.f32 %v267_v7, %v268_v8  ;;  %vm291_vm1 = vcmp.eq.s32.totalorder %v263_v20, 0  ;;  %vm292_vm2 = vcmp.eq.s32.totalorder %v263_v20, 1  ;;  %vm293_vm3 = vcmp.eq.s32.totalorder %v263_v20, 2  ;;  %s1017_s28 = scalar_lea.hbm %s1105_s2, %s513_s24  ;;  %s373_s18 = sshll.u32 %s981_s6, 4  ;;  %s1055_s18 = int_to_ptr.vmem [resolvable:$true] %s373_s18 }
  0x60   : > { %vm294_vm4 = vcmp.eq.s32.totalorder %v263_v20, 3  ;;  %v295_v37 = vsel %vm291_vm1, %v259_v1, 0.0  ;;  %v296_v38 = vsel %vm292_vm2, %v260_v2, 0.0  ;;  %v297_v44 = vsel %vm293_vm3, %v261_v3, 0.0  ;;  %s344_s22 = scalar_lea.sflag [#allocation4], %s960_s30  ;;  %s665_s23 = scalar_lea.vmem %s1019_s7, 16 }
  0x61   : > { %v271_v11 = vmax.f32 %v269_v9, %v270_v10  ;;  %v299_v42 = vsel %vm264_vm0, %v295_v37, 0.0  ;;  %v300_v43 = vsel %vm264_vm0, %v296_v38, 0.0  ;;  %v302_v48 = vsel %vm264_vm0, %v297_v44, 0.0  ;;  %p666_p8 = scmp.ne.s32.totalorder %s1019_s7, %s665_s23  ;;  %p1118_p0 = scmp.ne.s32.totalorder %s1111_s25, 0 }
  0x62   : > { %v301_v47 = vadd.f32 %v300_v43, %v299_v42  ;;  %v298_v49 = vsel %vm294_vm4, %v262_v4, 0.0  ;;  %s790_s8 = smov [#allocation7]  }
  0x63   : > { %v272_v12 = vsub.f32 %v259_v1, %v271_v11  ;;  %v273_v13 = vsub.f32 %v260_v2, %v271_v11  ;;  %v274_v14 = vsub.f32 %v261_v3, %v271_v11  ;;  %v275_v15 = vsub.f32 %v262_v4, %v271_v11  ;;  %v323_v5 = vld [vmem:[%s977_s4] sm:$0x1]  ;;  %p667_p11 = pnand %p666_p8, %p1118_p0  ;;  %s669_s10 = sshll.u32 %s790_s8, 4  ;;  %s670_s10 = int_to_ptr.vmem [resolvable:$false] %s669_s10 }
  0x64   : > { %v303_v51 = vadd.f32 %v302_v48, %v301_v47  ;;  %v304_v52 = vsel %vm264_vm0, %v298_v49, 0.0  ;;  %s671_s5 = scalar_lea.vmem %s670_s10, 32  ;;  %p672_p7 = scmp.lt.s32.totalorder %s1019_s7, %s670_s10 }
  0x65   : > { %v276_v16 = vmul.f32 1.442695, %v272_v12  ;;  %v278_v17 = vmul.f32 1.442695, %v273_v13  ;;  %v280_v18 = vmul.f32 1.442695, %v274_v14  ;;  %p668_p4 = pneg %p667_p11  ;;  %p673_p10 = scmp.lt.s32.totalorder %s671_s5, %s665_s23 }
  0x66   : > { %v282_v19 = vmul.f32 1.442695, %v275_v15  ;;  %v305_v56 = vadd.f32 %v304_v52, %v303_v51 }
  0x67   : > { %593 = vpow2.f32 %v276_v16  ;;  %p674_p12 = por %p673_p10, %p672_p7 }
  0x68   : > { %595 = vpow2.f32 %v278_v17 }
  0x69   : > { %597 = vpow2.f32 %v280_v18  ;;  %p675_p9 = pnand %p674_p12, %p668_p4 }
  0x6a   : > { %599 = vpow2.f32 %v282_v19 }
  0x71   : > { %v594_v21 = vpop.eup %593 }
  0x72   : > { %v596_v22 = vpop.eup %595  ;;  %v284_v23 = vsel %vm264_vm0, %v594_v21, 0.0  ;;  %v306_v26 = vsel %vm291_vm1, %v594_v21, 0.0 }
  0x73   : > { %v598_v24 = vpop.eup %597  ;;  %v285_v25 = vsel %vm264_vm0, %v596_v22, 0.0  ;;  %v307_v27 = vsel %vm292_vm2, %v596_v22, 0.0  ;;  %v310_v33 = vsel %vm264_vm0, %v306_v26, 0.0 }
  0x74   : > { %v600_v28 = vpop.eup %599  ;;  %v286_v29 = vadd.f32 %v285_v25, %v284_v23  ;;  %v287_v30 = vsel %vm264_vm0, %v598_v24, 0.0  ;;  %v311_v34 = vsel %vm264_vm0, %v307_v27, 0.0  ;;  %v308_v35 = vsel %vm293_vm3, %v598_v24, 0.0 }
  0x75   : > { %v289_v31 = vsel %vm264_vm0, %v600_v28, 0.0  ;;  %v312_v39 = vadd.f32 %v311_v34, %v310_v33  ;;  %v313_v40 = vsel %vm264_vm0, %v308_v35, 0.0  ;;  %v309_v41 = vsel %vm294_vm4, %v600_v28, 0.0 }
  0x76   : > { %v288_v32 = vadd.f32 %v287_v30, %v286_v29  ;;  %v315_v46 = vsel %vm264_vm0, %v309_v41, 0.0 }
  0x77   : > { %v314_v45 = vadd.f32 %v313_v40, %v312_v39 }
  0x78   : > { %v290_v36 = vadd.f32 %v289_v31, %v288_v32 }
  0x79   : > { %v316_v50 = vadd.f32 %v315_v46, %v314_v45 }
  0x7a   : > { %601 = vrcp.f32 %v290_v36 }
  0x7b   : > { %603 = vlog2.f32 %v290_v36 }
  0x84   : > { %v602_v53 = vpop.eup %601 }
  0x85   : > { %v604_v54 = vpop.eup %603  ;;  %v318_v55 = vmul.f32 %v602_v53, %v316_v50 }
  0x86   : > { %v320_v57 = vmul.f32 0.6931472, %v604_v54 }
  0x87   : > { %v324_v58 = vsel %vm264_vm0, %v318_v55, 0.0 }
  0x88   : > { %v325_v59 = vrot.slane %v324_v58, 4  ;;  %v321_v60 = vadd.f32 %v320_v57, %v271_v11  ;;  %v333_v11 = vld [vmem:[%s981_s6] sm:$0x1] }
  0x8a   : > { %v326_v61 = vadd.f32 %v325_v59, %v324_v58  ;;  %v322_v62 = vsub.f32 %v321_v60, %v305_v56 }
  0x8c   : > { %v327_v63 = vrot.slane %v326_v61, 2  ;;  %v334_v0 = vsel %vm264_vm0, %v322_v62, 0.0 }
  0x8d   : > { %v335_v1 = vrot.slane %v334_v0, 4 }
  0x8e   : > { %v328_v2 = vadd.f32 %v327_v63, %v326_v61 }
  0x8f   : > { %v336_v3 = vadd.f32 %v335_v1, %v334_v0 }
  0x90   : > { %v329_v4 = vrot.slane %v328_v2, 1 }
  0x91   : > { %v337_v6 = vrot.slane %v336_v3, 2 }
  0x92   : > { %v330_v7 = vadd.f32 %v329_v4, %v328_v2 }
  0x93   : > { %v338_v8 = vadd.f32 %v337_v6, %v336_v3 }
  0x94   : > { %v331_v9 = vadd.f32 %v330_v7, %v323_v5 }
  0x95   : > { %v339_v10 = vrot.slane %v338_v8, 1 }
  0x96   : > { %332 = vst [vmem:[%s977_s4] sm:$0x1] %v331_v9 }
  0x97   : > { %v340_v12 = vadd.f32 %v339_v10, %v338_v8 }
  0x98   : > { %678 = shalt.err (!%p675_p9)
}
  0x99   : > { %s679_s9 = scalar_lea.hbm %s1017_s28, 16  ;;  %s683_s4 = scalar_lea.hbm %s1105_s2, 32 }
  0x9a   : > { %p680_p1 = scmp.ne.s32.totalorder %s1017_s28, %s679_s9  ;;  %p684_p5 = scmp.lt.u32.totalorder %s1017_s28, %s1105_s2 }
  0x9b   : > { %p685_p13 = scmp.lt.u32.totalorder %s683_s4, %s679_s9  ;;  %p687_p8 = scmp.lt.u32.totalorder %s679_s9, %s1017_s28 }
  0x9c   : > { %p681_p6 = pnand %p680_p1, %p1118_p0 }
  0x9d   : > { %p686_p3 = por %p685_p13, %p684_p5 }
  0x9e   : > { %p682_p2 = pneg %p681_p6 }
  0x9f   : > { %p688_p11 = por %p687_p8, %p686_p3 }
  0xa1   : > { %p689_p4 = pnand %p688_p11, %p682_p2 }
  0xa3   : > { %692 = shalt.err (!%p689_p4)
}
  0xa4   : > { %522 = dma.vmem_to_hbm [thread:$0]  (%p1118_p0), %s1019_s7, 16, %s1017_s28, %s344_s22   ;;  %v341_v13 = vadd.f32 %v340_v12, %v333_v11 }
  0xa5   : > { %s1051_s10 = scalar_lea.hbm %s1106_s3, %s513_s24  ;;  %s348_s5 = scalar_lea.sflag [#allocation9], %s960_s30 }
  0xa6   : > { %342 = vst [vmem:[%s981_s6] sm:$0x1] %v341_v13  ;;  %s693_s9 = scalar_lea.vmem %s1055_s18, 16  ;;  %s791_s7 = smov [#allocation8]  }
  0xa7   : > { %p694_p7 = scmp.ne.s32.totalorder %s1055_s18, %s693_s9  ;;  %s697_s15 = sshll.u32 %s791_s7, 4  ;;  %s698_s15 = int_to_ptr.vmem [resolvable:$false] %s697_s15 }
  0xa8   : > { %s699_s28 = scalar_lea.vmem %s698_s15, 32  ;;  %p700_p9 = scmp.lt.s32.totalorder %s1055_s18, %s698_s15 }
  0xa9   : > { %p695_p10 = pnand %p694_p7, %p1118_p0  ;;  %p701_p1 = scmp.lt.s32.totalorder %s699_s28, %s693_s9 }
  0xab   : > { %p696_p12 = pneg %p695_p10  ;;  %p702_p6 = por %p701_p1, %p700_p9 }
  0xad   : > { %p703_p2 = pnand %p702_p6, %p696_p12 }
  0xaf   : > { %706 = shalt.err (!%p703_p2)
}
  0xb0   : > { %s707_s30 = scalar_lea.hbm %s1051_s10, 16  ;;  %s711_s22 = scalar_lea.hbm %s1106_s3, 32 }
  0xb1   : > { %p708_p5 = scmp.ne.s32.totalorder %s1051_s10, %s707_s30  ;;  %p712_p8 = scmp.lt.u32.totalorder %s1051_s10, %s1106_s3 }
  0xb2   : > { %p713_p11 = scmp.lt.u32.totalorder %s711_s22, %s707_s30  ;;  %p715_p7 = scmp.lt.u32.totalorder %s707_s30, %s1051_s10 }
  0xb3   : > { %p709_p13 = pnand %p708_p5, %p1118_p0 }
  0xb4   : > { %p714_p4 = por %p713_p11, %p712_p8 }
  0xb5   : > { %p710_p3 = pneg %p709_p13 }
  0xb6   : > { %p716_p10 = por %p715_p7, %p714_p4 }
  0xb8   : > { %p717_p12 = pnand %p716_p10, %p710_p3 }
  0xba   : > { %720 = shalt.err (!%p717_p12)
}
  0xbb   : > { %523 = dma.vmem_to_hbm [thread:$0]  (%p1118_p0), %s1055_s18, 16, %s1051_s10, %s348_s5  }
  0xbc PF: > { %s385_s4 = sand.u32 1, %s763_s12   ;;  %p1119_p9 = scmp.ne.s32.totalorder %s1112_s27, 0 }
  0xbd   : > { %p1120_p1 = scmp.ge.s32.totalorder %s783_s17, 2  ;;  %s386_s11 = scalar_lea.sflag [#allocation4], %s385_s4 }
  0xbf   : > { %p534_p6 = pnand %p1120_p1, %p1119_p9 }
  0xc1   : > { %754 = dma.done.wait (!%p534_p6), %s386_s11, 16  }
  0xc2   : > { %756 = vsyncadd (!%p534_p6), %s386_s11, 4294967280  ;;  %s394_s19 = scalar_lea.sflag [#allocation9], %s385_s4 }
  0xc3   : > { %758 = dma.done.wait (!%p534_p6), %s394_s19, 16  }
  0xc4   : > { %760 = vsyncadd (!%p534_p6), %s394_s19, 4294967280  ;;  %s26_s17 = sadd.s32 1, %s783_s17   ;;  %s1121_s12 = smov %s767_s13 }
  0xc5   : > { %p23_p2 = scmp.ge.s32.totalorder %s26_s17, 4   ;;  %s1122_s13 = smov %s771_s14 }
  0xc6   : > { %s1123_s14 = smov %s868_s26  ;;  %s1124_s15 = smov %s779_s16 }
  0xc7   : > { %s1125_s16 = smov %s1127_s20  ;;  %25 = sbr.rel (!%p23_p2) target bundleno = 10 (0xa), region = 107 }
  0xce   :  { %398 = vsyncpa [#allocation3], 1 }
  0xcf   :  { %400 = vsyncpa [#allocation3 + $0x1], 1 }
  0xd0   :  { %401 = vsyncpa [#allocation6], 1 }
  0xd1   :  { %403 = vsyncpa [#allocation6 + $0x1], 1 }
  0xd2   :  { %404 = vsyncpa [#allocation4], 1 }
  0xd3   :  { %406 = vsyncpa [#allocation4 + $0x1], 1 }
  0xd4   :  { %407 = vsyncpa [#allocation9], 1 }
  0xd5   :  { %409 = vsyncpa [#allocation9 + $0x1], 1 }

</bundles_post_ra>
